<compile_context>
chip_gen: v7x
topology: tpu7x:2x2x1
jax: 0.10.0
libtpu: 0.0.40
codegen_flags: <defaults>
</compile_context>

<pallas_src>
import math

import jax
import jax.numpy as jnp
import numpy as np
from jax.experimental import pallas as pl
from jax.experimental.pallas import tpu as pltpu


# ---------------------------------------------------------------------------
# Tunables / hardware queries
# ---------------------------------------------------------------------------
_MIN_GRID_STEPS = 8            # target minimum grid steps (pipelining/megacore)
_KRON_MAX_ELEMS = 1 << 20      # single-matmul kron(Ah,Aw) path when
                               # H*W*Ho*Wo <= this (4 MiB f32) and Wo < 128
_BF16_MIN_PIXELS = 256 * 256   # feed the MXU in bf16 for images >= this size
_FORCE_MAX_THO = None          # test hook: cap the Ho tile of the remap path

_VMEM_LIMIT_CACHE = None


def _vmem_limit_bytes():
    """Generation-aware scoped-VMEM request.
    v5e/v6e (128 MiB physical) -> 96 MiB, v7x (64 MiB physical) -> 48 MiB."""
    global _VMEM_LIMIT_CACHE
    if _VMEM_LIMIT_CACHE is None:
        try:
            cap = int(pltpu.get_tpu_info().vmem_capacity_bytes)
        except Exception:
            cap = 64 * 1024 * 1024              # conservative (v7x per-core)
        _VMEM_LIMIT_CACHE = max(32 * 1024 * 1024,
                                min(96 * 1024 * 1024, (cap * 3) // 4))
    return _VMEM_LIMIT_CACHE


def _mxu_dtype(h, w):
    # bf16 MXU inputs (f32 accumulation) for large, compute-bound images.
    return jnp.bfloat16 if h * w >= _BF16_MIN_PIXELS else jnp.float32


# ---------------------------------------------------------------------------
# Host-side construction of the (pre-composed) interpolation matrices
# ---------------------------------------------------------------------------
def _linear_resize_matrix(in_size, out_size, scale_factor):
    """1-D matrix matching F.interpolate(mode='bilinear', align_corners=False,
    scale_factor=..., recompute_scale_factor=None)."""
    m = np.zeros((out_size, in_size), dtype=np.float32)
    for o in range(out_size):
        src = (o + 0.5) / scale_factor - 0.5
        src = max(src, 0.0)
        x0 = min(int(math.floor(src)), in_size - 1)
        x1 = min(x0 + 1, in_size - 1)
        lam = src - x0
        m[o, x0] += 1.0 - lam
        m[o, x1] += lam
    return m


def _composed_resize_matrices(h, w, n_stages, multiplier):
    """Compose n_stages of separable bilinear resize into one (Ah, Aw) pair."""
    ah = np.eye(h, dtype=np.float32)
    aw = np.eye(w, dtype=np.float32)
    hc, wc = h, w
    for _ in range(n_stages):
        ho = int(math.floor(hc * multiplier))
        wo = int(math.floor(wc * multiplier))
        ah = _linear_resize_matrix(hc, ho, multiplier) @ ah
        aw = _linear_resize_matrix(wc, wo, multiplier) @ aw
        hc, wc = ho, wo
    return ah, aw, hc, wc


class _Mats:
    """Device-resident resize matrices for one (H, W)."""

    def __init__(self, ah, aw, ho, wo):
        self.ho, self.wo = ho, wo
        self.ah = jnp.asarray(ah)                          # (Ho, H)
        self.ahT = jnp.asarray(np.ascontiguousarray(ah.T))  # (H, Ho)
        self.awT = jnp.asarray(np.ascontiguousarray(aw.T))  # (W, Wo)
        h, w = ah.shape[1], aw.shape[1]
        if 0 < wo < 128 and h * w * ho * wo <= _KRON_MAX_ELEMS:
            # whole separable resize pre-composed into one matrix
            self.akT = jnp.asarray(
                np.ascontiguousarray(np.kron(ah, aw).T))   # (H*W, Ho*Wo)
        else:
            self.akT = None


# ---------------------------------------------------------------------------
# Kernels
# ---------------------------------------------------------------------------
def _kron_kernel(has_ctx, mdt):
    """Resize as ONE matmul on spatially flattened data (+context)."""
    def kernel(akT_ref, x_ref, *rest):
        ctx_ref, o_ref = rest if has_ctx else (None, rest[0])
        x = x_ref[...].astype(mdt)                              # (TB, H*W)
        out = jnp.dot(x, akT_ref[...],
                      preferred_element_type=jnp.float32)       # (TB, Ho*Wo)
        if has_ctx:
            out = out + ctx_ref[...]
        o_ref[...] = out.astype(o_ref.dtype)
    return kernel


def _sep_resize(x, awT, ahT, mdt):
    """Separable resize of x (Ch, H, W) -> (Ch, Ho_blk, Wo) as two big 2-D
    matmuls; the minor-dim transposes run on the XLU and overlap the MXU."""
    ch, h, w = x.shape
    wo = awT.shape[1]
    ho = ahT.shape[1]
    t = jnp.dot(x.reshape(ch * h, w), awT,
                preferred_element_type=jnp.float32)             # (Ch*H, Wo)
    t = jnp.swapaxes(t.reshape(ch, h, wo), 1, 2)                # (Ch, Wo, H)
    r = jnp.dot(t.reshape(ch * wo, h).astype(mdt), ahT,
                preferred_element_type=jnp.float32)             # (Ch*Wo, Ho)
    return jnp.swapaxes(r.reshape(ch, wo, ho), 1, 2)            # (Ch, Ho, Wo)


def _sep_kernel(has_ctx, mdt):
    def kernel(ahT_ref, awT_ref, x_ref, *rest):
        ctx_ref, o_ref = rest if has_ctx else (None, rest[0])
        out = _sep_resize(x_ref[...].astype(mdt), awT_ref[...], ahT_ref[...],
                          mdt)
        if has_ctx:
            out = out + ctx_ref[...]
        o_ref[...] = out.astype(o_ref.dtype)
    return kernel


def _kron_remap_kernel(has_ctx, remap_first, mdt):
    """Single-matmul resize + 1x1-conv remap (+bias) (+context): all 2-D."""
    def kernel(akT_ref, w_ref, b_ref, x_ref, *rest):
        ctx_ref, o_ref = rest if has_ctx else (None, rest[0])
        x = x_ref[...].astype(mdt)                              # (C, H*W)
        wm = w_ref[...].astype(mdt)                             # (O, C)
        if remap_first:                                         # O << C
            y = jnp.dot(wm, x, preferred_element_type=jnp.float32)
            out = jnp.dot(y.astype(mdt), akT_ref[...],
                          preferred_element_type=jnp.float32)   # (O, Ho*Wo)
        else:
            r = jnp.dot(x, akT_ref[...], preferred_element_type=jnp.float32)
            out = jnp.dot(wm, r.astype(mdt),
                          preferred_element_type=jnp.float32)   # (O, Ho*Wo)
        out = out + b_ref[...]                                  # (O,1) bcast
        if has_ctx:
            out = out + ctx_ref[...]
        o_ref[...] = out.astype(o_ref.dtype)
    return kernel


def _sep_remap_kernel(has_ctx, remap_first, mdt):
    """Separable resize (Ho-tiled) + 1x1-conv remap (+bias) (+context)."""
    def kernel(ah_ref, awT_ref, w_ref, b_ref, x_ref, *rest):
        ctx_ref, o_ref = rest if has_ctx else (None, rest[0])
        x = x_ref[...].astype(mdt)                              # (C, H, W)
        wm = w_ref[...].astype(mdt)                             # (O, C)
        ahT = jnp.swapaxes(ah_ref[...], 0, 1)                   # (H, t_ho)
        if remap_first:
            y = jnp.einsum("oc,chw->ohw", wm, x,
                           preferred_element_type=jnp.float32)  # (O, H, W)
            out = _sep_resize(y.astype(mdt), awT_ref[...], ahT, mdt)
        else:
            r = _sep_resize(x, awT_ref[...], ahT, mdt)          # (C, t_ho, Wo)
            out = jnp.einsum("oc,chv->ohv", wm, r.astype(mdt),
                             preferred_element_type=jnp.float32)
        out = out + b_ref[...][:, :, None]
        if has_ctx:
            out = out + ctx_ref[...]
        o_ref[...] = out.astype(o_ref.dtype)
    return kernel


# ---------------------------------------------------------------------------
# Tiling helpers
# ---------------------------------------------------------------------------
def _pick_batch_tile(b, per_row_bytes, fixed_bytes, budget, sublane_align):
    """Largest batch tile fitting the VMEM budget, capped so the grid has
    >= _MIN_GRID_STEPS steps.  `sublane_align` enforces the (8,128) rule when
    the batch dim is the 2nd-minor dim of the block."""
    tb = max(1, (budget - fixed_bytes) // max(per_row_bytes, 1))
    tb = min(tb, b, max(1, pl.cdiv(b, _MIN_GRID_STEPS)))
    if sublane_align and tb < b:
        tb = max(8, (tb // 8) * 8)
    return min(tb, b)


def _choose_ho_tile(ho, bytes_fn, budget):
    t = ho
    if bytes_fn(t) > budget:
        t = max(8, (ho // 8) * 8)
        while t > 8 and bytes_fn(t) > budget:
            t -= 8
    if _FORCE_MAX_THO is not None:
        t = min(t, max(8, _FORCE_MAX_THO))
    return min(t, ho)


# ---------------------------------------------------------------------------
# pallas_call wrappers
# ---------------------------------------------------------------------------
def _resize_no_remap(x, mats, context):
    """x: (N, C, H, W) -> (N, C, Ho, Wo), optionally fused `+ context`."""
    n, c, h, w = x.shape
    ho, wo = mats.ho, mats.wo
    b = n * c
    has_ctx = context is not None
    cio = 2 if has_ctx else 1
    mdt = _mxu_dtype(h, w)
    msize = 2 if mdt is jnp.bfloat16 else 4
    vmem_limit = _vmem_limit_bytes()
    budget = vmem_limit // 2

    if mats.akT is not None:
        # ---- single-matmul (kron) path: lane-dense loads AND stores --------
        hw, howo = h * w, ho * wo
        per_row = 4 * (2 * hw + 2 * cio * howo + howo)      # blocks + f32 acc
        fixed = 2 * hw * howo * msize                        # kron matrix
        tb = _pick_batch_tile(b, per_row, fixed, budget, sublane_align=True)
        grid = (pl.cdiv(b, tb),)
        in_specs = [pl.BlockSpec((hw, howo), lambda i: (0, 0)),
                    pl.BlockSpec((tb, hw), lambda i: (i, 0))]
        args = [mats.akT.astype(mdt), x.reshape(b, hw)]
        if has_ctx:
            in_specs.append(pl.BlockSpec((tb, howo), lambda i: (i, 0)))
            args.append(context.reshape(b, howo))
        flops = 2 * b * hw * howo + (b * howo if has_ctx else 0)
        bytes_acc = 4 * b * (hw + cio * howo) + hw * howo * msize
        out = pl.pallas_call(
            _kron_kernel(has_ctx, mdt),
            out_shape=jax.ShapeDtypeStruct((b, howo), x.dtype),
            grid=grid, in_specs=in_specs,
            out_specs=pl.BlockSpec((tb, howo), lambda i: (i, 0)),
            compiler_params=pltpu.CompilerParams(
                dimension_semantics=("parallel",),
                vmem_limit_bytes=vmem_limit),
            cost_estimate=pl.CostEstimate(flops=flops, transcendentals=0,
                                          bytes_accessed=bytes_acc),
        )(*args)
        # (b, Ho*Wo) row-major == (N, C, Ho, Wo) row-major -> free reshape
        return out.reshape(n, c, ho, wo)

    # ---- separable path (Wo >= 128 or kron matrix too large) ----------------
    # NOTE: stores are masked only if Wo < 128 here, i.e. only when the kron
    # matrix would not fit VMEM.
    per_row = 4 * (2 * h * w + 2 * cio * ho * wo            # blocks (2 buf)
                   + 2 * h * wo + wo * ho + ho * wo)         # f32 intermediates
    fixed = 2 * (h * ho + w * wo) * msize
    tb = _pick_batch_tile(b, per_row, fixed, budget, sublane_align=False)
    grid = (pl.cdiv(b, tb),)
    in_specs = [pl.BlockSpec((h, ho), lambda i: (0, 0)),
                pl.BlockSpec((w, wo), lambda i: (0, 0)),
                pl.BlockSpec((tb, h, w), lambda i: (i, 0, 0))]
    args = [mats.ahT.astype(mdt), mats.awT.astype(mdt), x.reshape(b, h, w)]
    if has_ctx:
        in_specs.append(pl.BlockSpec((tb, ho, wo), lambda i: (i, 0, 0)))
        args.append(context.reshape(b, ho, wo))
    flops = 2 * b * (h * w * wo + wo * ho * h) + (b * ho * wo if has_ctx else 0)
    bytes_acc = 4 * b * (h * w + cio * ho * wo) + (h * ho + w * wo) * msize
    out = pl.pallas_call(
        _sep_kernel(has_ctx, mdt),
        out_shape=jax.ShapeDtypeStruct((b, ho, wo), x.dtype),
        grid=grid, in_specs=in_specs,
        out_specs=pl.BlockSpec((tb, ho, wo), lambda i: (i, 0, 0)),
        compiler_params=pltpu.CompilerParams(
            dimension_semantics=("parallel",),
            vmem_limit_bytes=vmem_limit),
        cost_estimate=pl.CostEstimate(flops=flops, transcendentals=0,
                                      bytes_accessed=bytes_acc),
    )(*args)
    return out.reshape(n, c, ho, wo)


def _resize_remap(x, mats, weight, bias, context):
    """x: (N, C, H, W) -> resize -> 1x1 conv (O channels, +bias) -> (+context)."""
    n, c, h, w = x.shape
    ho, wo = mats.ho, mats.wo
    o_ch = weight.shape[0]
    has_ctx = context is not None
    cio = 2 if has_ctx else 1
    mdt = _mxu_dtype(h, w)
    msize = 2 if mdt is jnp.bfloat16 else 4
    vmem_limit = _vmem_limit_bytes()
    budget = vmem_limit // 2
    b2 = bias.reshape(o_ch, 1).astype(jnp.float32)
    wmat = weight.astype(jnp.float32)
    hw, howo = h * w, ho * wo

    # pick 1x1-remap-before-resize vs. after by static FLOP count
    if mats.akT is not None:
        f_remap_first = 2 * o_ch * c * hw + 2 * o_ch * hw * howo
        f_resize_first = 2 * c * hw * howo + 2 * o_ch * c * howo
    else:
        def rs(ch):
            return 2 * ch * (hw * wo + wo * ho * h)
        f_remap_first = 2 * o_ch * c * hw + rs(o_ch)
        f_resize_first = rs(c) + 2 * o_ch * c * howo
    remap_first = f_remap_first < f_resize_first
    flops = n * (min(f_remap_first, f_resize_first) + o_ch * howo * cio)
    bytes_acc = 4 * (n * c * hw + n * o_ch * howo * cio + o_ch * c + o_ch)

    if mats.akT is not None:
        # ---- single-matmul resize + fused remap: three clean 2-D matmuls ----
        in_specs = [pl.BlockSpec((hw, howo), lambda i: (0, 0)),
                    pl.BlockSpec((o_ch, c), lambda i: (0, 0)),
                    pl.BlockSpec((o_ch, 1), lambda i: (0, 0)),
                    pl.BlockSpec((None, c, hw), lambda i: (i, 0, 0))]
        args = [mats.akT.astype(mdt), wmat, b2, x.reshape(n, c, hw)]
        if has_ctx:
            in_specs.append(
                pl.BlockSpec((None, o_ch, howo), lambda i: (i, 0, 0)))
            args.append(context.reshape(n, o_ch, howo))
        out = pl.pallas_call(
            _kron_remap_kernel(has_ctx, remap_first, mdt),
            out_shape=jax.ShapeDtypeStruct((n, o_ch, howo), x.dtype),
            grid=(n,), in_specs=in_specs,
            out_specs=pl.BlockSpec((None, o_ch, howo), lambda i: (i, 0, 0)),
            compiler_params=pltpu.CompilerParams(
                dimension_semantics=("parallel",),
                vmem_limit_bytes=vmem_limit),
            cost_estimate=pl.CostEstimate(
                flops=flops, transcendentals=0,
                bytes_accessed=bytes_acc + hw * howo * msize),
        )(*args)
        return out.reshape(n, o_ch, ho, wo)

    # ---- separable resize + fused remap; tile over output rows (Ho) --------
    ch_i = o_ch if remap_first else c

    def tile_bytes(t_ho):
        elems = (2 * c * h * w                                   # x block (2x)
                 + 2 * cio * o_ch * t_ho * wo                    # out/ctx (2x)
                 + (o_ch * h * w if remap_first else 0)          # remapped y
                 + 2 * ch_i * h * wo                             # t (+transpose)
                 + 2 * ch_i * wo * t_ho                          # r (+transpose)
                 + o_ch * t_ho * wo                              # pre-store
                 + ho * h + w * wo + o_ch * c + o_ch)            # matrices
        return 4 * elems

    t_ho = _choose_ho_tile(ho, tile_bytes, budget)
    n_ho = pl.cdiv(ho, t_ho)
    # TODO(synk): if even a single Ho row-tile exceeds the VMEM budget (very
    # large C*H*W), a C-blocked accumulating variant would be needed.
    in_specs = [pl.BlockSpec((t_ho, h), lambda i, j: (j, 0)),     # Ah rows
                pl.BlockSpec((w, wo), lambda i, j: (0, 0)),
                pl.BlockSpec((o_ch, c), lambda i, j: (0, 0)),
                pl.BlockSpec((o_ch, 1), lambda i, j: (0, 0)),
                pl.BlockSpec((None, c, h, w), lambda i, j: (i, 0, 0, 0))]
    args = [mats.ah.astype(mdt), mats.awT.astype(mdt), wmat, b2, x]
    if has_ctx:
        in_specs.append(
            pl.BlockSpec((None, o_ch, t_ho, wo), lambda i, j: (i, 0, j, 0)))
        args.append(context)
    out = pl.pallas_call(
        _sep_remap_kernel(has_ctx, remap_first, mdt),
        out_shape=jax.ShapeDtypeStruct((n, o_ch, ho, wo), x.dtype),
        grid=(n, n_ho), in_specs=in_specs,
        out_specs=pl.BlockSpec((None, o_ch, t_ho, wo),
                               lambda i, j: (i, 0, j, 0)),
        compiler_params=pltpu.CompilerParams(
            dimension_semantics=("parallel", "parallel"),
            vmem_limit_bytes=vmem_limit),
        cost_estimate=pl.CostEstimate(
            flops=flops, transcendentals=0,
            bytes_accessed=bytes_acc + (h * ho + w * wo) * msize),
    )(*args)
    return out


# ---------------------------------------------------------------------------
# SpatialRescaler module (JAX / Pallas)
# ---------------------------------------------------------------------------
class SpatialRescaler:
    def __init__(self, n_stages=1, method="bilinear", multiplier=0.5,
                 in_channels=3, out_channels=None, bias=False, key=None):
        assert n_stages >= 0
        assert method in ["nearest", "linear", "bilinear", "trilinear",
                          "bicubic", "area"]
        if method != "bilinear":
            # TODO(synk): only the default 'bilinear' mode is implemented as a
            # Pallas kernel.
            raise NotImplementedError("only method='bilinear' is implemented")
        self.n_stages = n_stages
        self.multiplier = multiplier
        self.remap_output = out_channels is not None
        self._mats_cache = {}      # (H, W) -> _Mats
        if self.remap_output:
            # (original module prints:
            #  f'Spatial Rescaler mapping from {in_channels} to {out_channels}
            #  channels after resizing.')
            if key is None:
                key = jax.random.PRNGKey(42)
            wkey, bkey = jax.random.split(key)
            bound = 1.0 / math.sqrt(in_channels)    # Conv2d(k=1) default init
            self.weight = jax.random.uniform(
                wkey, (out_channels, in_channels), minval=-bound, maxval=bound,
                dtype=jnp.float32)
            if bias:
                self.bias = jax.random.uniform(
                    bkey, (out_channels,), minval=-bound, maxval=bound,
                    dtype=jnp.float32)
            else:
                self.bias = jnp.zeros((out_channels,), jnp.float32)

    def _mats(self, h, w):
        key = (h, w)
        if key not in self._mats_cache:
            ah, aw, ho, wo = _composed_resize_matrices(
                h, w, self.n_stages, self.multiplier)
            self._mats_cache[key] = _Mats(ah, aw, ho, wo)
        return self._mats_cache[key]

    def __call__(self, x, context=None):
        _, _, h, w = x.shape
        if self.remap_output:
            return _resize_remap(x, self._mats(h, w), self.weight, self.bias,
                                 context)
        if self.n_stages == 0:
            return x if context is None else x + context
        return _resize_no_remap(x, self._mats(h, w), context)

    def encode(self, x):
        return self(x)


# ---------------------------------------------------------------------------
# Demo / self-check
# ---------------------------------------------------------------------------
if __name__ == "__main__":
    keys = jax.random.split(jax.random.PRNGKey(0), 8)
    x = jax.random.normal(keys[0], (2, 4, 16, 16), dtype=jnp.float32)

    # case 1: 1 stage x0.5, no remap (single-matmul / lane-dense path).
    model = SpatialRescaler(n_stages=1, method="bilinear", multiplier=0.5,
                            in_channels=4)
    y = jax.block_until_ready(model(x))
    assert y.shape == (2, 4, 8, 8)
    # scale_factor=0.5 bilinear(align_corners=False) == 2x2 average pool
    ref = x.reshape(2, 4, 8, 2, 8, 2).mean(axis=(3, 5))
    assert jnp.allclose(y, ref, atol=1e-4), "case1: resize mismatch"

    # case 2: fused context add.
    ctx1 = jax.random.normal(keys[1], (2, 4, 8, 8), dtype=jnp.float32)
    y = jax.block_until_ready(model(x, context=ctx1))
    assert jnp.allclose(y, ref + ctx1, atol=1e-4), "case2: resize+ctx mismatch"

    # cases 3/4: 2 stages + 1x1-conv remap (bias) (+context), fused.
    model2 = SpatialRescaler(n_stages=2, method="bilinear", multiplier=0.5,
                             in_channels=4, out_channels=8, bias=True,
                             key=jax.random.PRNGKey(1))
    ctx2 = jax.random.normal(keys[2], (2, 8, 4, 4), dtype=jnp.float32)
    rr = x.reshape(2, 4, 4, 4, 4, 4).mean(axis=(3, 5))
    ref2 = (jnp.einsum("oc,nchw->nohw", model2.weight, rr)
            + model2.bias[None, :, None, None])
    y = jax.block_until_ready(model2(x, context=ctx2))
    assert y.shape == (2, 8, 4, 4)
    assert jnp.allclose(y, ref2 + ctx2, atol=1e-3), "case3: remap+ctx mismatch"
    y = jax.block_until_ready(model2(x))
    assert jnp.allclose(y, ref2, atol=1e-3), "case4: remap mismatch"

    # case 5: out_channels < in_channels -> remap-before-resize ordering.
    model3 = SpatialRescaler(n_stages=1, method="bilinear", multiplier=0.5,
                             in_channels=8, out_channels=2, bias=False,
                             key=jax.random.PRNGKey(2))
    x3 = jax.random.normal(keys[3], (2, 8, 16, 16), dtype=jnp.float32)
    rr3 = x3.reshape(2, 8, 8, 2, 8, 2).mean(axis=(3, 5))
    ref3 = jnp.einsum("oc,nchw->nohw", model3.weight, rr3)
    y = jax.block_until_ready(model3(x3))
    assert jnp.allclose(y, ref3, atol=1e-3), "case5: remap-first mismatch"

    # case 6: larger image -> separable (two big 2-D matmuls) path.
    x6 = jax.random.normal(keys[4], (2, 4, 64, 64), dtype=jnp.float32)
    y = jax.block_until_ready(model(x6))
    ref6 = x6.reshape(2, 4, 32, 2, 32, 2).mean(axis=(3, 5))
    assert y.shape == (2, 4, 32, 32)
    assert jnp.allclose(y, ref6, atol=1e-4), "case6: separable resize mismatch"

    # case 7: larger image + remap + ctx, exercising the Ho-tiled remap path.
    _FORCE_MAX_THO = 16
    model4 = SpatialRescaler(n_stages=1, method="bilinear", multiplier=0.5,
                             in_channels=6, out_channels=4, bias=True,
                             key=jax.random.PRNGKey(3))
    x7 = jax.random.normal(keys[5], (1, 6, 64, 64), dtype=jnp.float32)
    ctx7 = jax.random.normal(keys[6], (1, 4, 32, 32), dtype=jnp.float32)
    rr7 = x7.reshape(1, 6, 32, 2, 32, 2).mean(axis=(3, 5))
    ref7 = (jnp.einsum("oc,nchw->nohw", model4.weight, rr7)
            + model4.bias[None, :, None, None] + ctx7)
    y = jax.block_until_ready(model4(x7, context=ctx7))
    assert jnp.allclose(y, ref7, atol=1e-3), "case7: separable remap mismatch"
    _FORCE_MAX_THO = None

    # case 8: bf16-MXU path (auto for large images; forced here on small ones).
    _BF16_MIN_PIXELS = 0
    y = jax.block_until_ready(model(x))
    assert jnp.allclose(y, ref, atol=5e-2), "case8: bf16 resize mismatch"
    _BF16_MIN_PIXELS = 256 * 256

    print("KERNEL_OK")
</pallas_src>

<mosaic_0001>
module attributes {stable_mosaic.version = 11 : i64} {
  func.func @kernel(%arg0: i32, %arg1: memref<256x64xf32, #tpu.memory_space<vmem>>, %arg2: memref<8x256xf32, #tpu.memory_space<vmem>>, %arg3: memref<8x64xf32, #tpu.memory_space<vmem>>) attributes {dimension_semantics = [#tpu.dimension_semantics<parallel>], iteration_bounds = array<i64: 1>, scalar_prefetch = 0 : i64, scratch_operands = 0 : i64, tpu.core_type = #tpu.core_type<tc>, window_params = [{pipeline_mode = #tpu.pipeline_mode<synchronous>, transform_indices = @transform_0, window_bounds = array<i64: 256, 64>}, {transform_indices = @transform_1, window_bounds = array<i64: 8, 256>}, {transform_indices = @transform_2, window_bounds = array<i64: 8, 64>}]} {
    %c0 = arith.constant 0 : index
    %c0_0 = arith.constant 0 : index
    %0 = vector.load %arg2[%c0, %c0_0] : memref<8x256xf32, #tpu.memory_space<vmem>>, vector<8x256xf32>
    %c0_1 = arith.constant 0 : index
    %c0_2 = arith.constant 0 : index
    %1 = vector.load %arg1[%c0_1, %c0_2] : memref<256x64xf32, #tpu.memory_space<vmem>>, vector<256x64xf32>
    %cst = arith.constant dense<0.000000e+00> : vector<8x64xf32>
    %2 = tpu.matmul %0, %1, %cst {dimension_numbers = #tpu.dot_dimension_numbers<[1], [0], [0], [1], [0, 0, 1, 1], [], []>} : vector<8x256xf32>, vector<256x64xf32>, vector<8x64xf32> -> vector<8x64xf32>
    %c0_3 = arith.constant 0 : index
    %c0_4 = arith.constant 0 : index
    %3 = vector.load %arg3[%c0_3, %c0_4] : memref<8x64xf32, #tpu.memory_space<vmem>>, vector<8x64xf32>
    tpu.vector_store %arg3[%c0_3, %c0_4], %2 {strides = array<i32>} : memref<8x64xf32, #tpu.memory_space<vmem>>, vector<8x64xf32>,
    return
  }
  func.func @transform_0(%arg0: i32) -> (i32, i32) {
    %c0_i32 = arith.constant 0 : i32
    %c0_i32_0 = arith.constant 0 : i32
    %c0_i32_1 = arith.constant 0 : i32
    return %c0_i32, %c0_i32_0 : i32, i32
  }
  func.func @transform_1(%arg0: i32) -> (i32, i32) {
    %c0_i32 = arith.constant 0 : i32
    %c0_i32_0 = arith.constant 0 : i32
    return %arg0, %c0_i32 : i32, i32
  }
  func.func @transform_2(%arg0: i32) -> (i32, i32) {
    %c0_i32 = arith.constant 0 : i32
    %c0_i32_0 = arith.constant 0 : i32
    return %arg0, %c0_i32 : i32, i32
  }
}

</mosaic_0001>

<bundles_post_ra>
// kernel: tpu_custom_call.1
= control target key start
LH: loop header
LB: loop body
LE: loop exit
PB: predicated region body
PF: predicated region fallthrough
CT: control target
= control target key end

     0   :  { %s354_s0 = inlined_call_operand.vmem [shape: f32[256,64], index: 0, kind: input, shape index: {}]   ;;  %s355_s1 = inlined_call_operand.vmem [shape: f32[8,256], index: 1, kind: input, shape index: {}]   ;;  %s356_s2 = inlined_call_operand.hbm [shape: f32[8,64], index: 2, kind: output, shape index: {}]  }
   0x1   :  { %v30_v0 = vld [vmem:[%s354_s0 + $0x80] sm:$0xff]  ;;  %v31_v1 = vld [vmem:[%s354_s0 + $0x88] sm:$0xff]  ;;  %v32_v5 = vld [vmem:[%s354_s0 + $0x90] sm:$0xff] }
   0x2   :  { %v14_v2 = vld [vmem:[%s354_s0] sm:$0xff]  ;;  %v167_v3 = vpack.c.bf16 %v31_v1, %v30_v0  ;;  %v15_v4 = vld [vmem:[%s354_s0 + $0x8] sm:$0xff]  ;;  %v33_v6 = vld [vmem:[%s354_s0 + $0x98] sm:$0xff] }
   0x3   :  { %v169_v7 = vpack.c.bf16 %v15_v4, %v14_v2  ;;  %v171_v8 = vpack.c.bf16 %v33_v6, %v32_v5  ;;  %v16_v9 = vld [vmem:[%s354_s0 + $0x10] sm:$0xff]  ;;  %v17_v10 = vld [vmem:[%s354_s0 + $0x18] sm:$0xff]  ;;  %v34_v11 = vld [vmem:[%s354_s0 + $0xa0] sm:$0xff] }
   0x4   :  { %168 = vmatprep.subr.bf16.mxu0 %v167_v3  ;;  %v35_v12 = vld [vmem:[%s354_s0 + $0xa8] sm:$0xff]  ;;  %v173_v13 = vpack.c.bf16 %v17_v10, %v16_v9  ;;  %v18_v15 = vld [vmem:[%s354_s0 + $0x20] sm:$0xff]  ;;  %v36_v17 = vld [vmem:[%s354_s0 + $0xb0] sm:$0xff] }
   0x5   :  { %170 = vmatpush3.bf16.msra.mxu0 %v169_v7  ;;  %v175_v14 = vpack.c.bf16 %v35_v12, %v34_v11  ;;  %v19_v16 = vld [vmem:[%s354_s0 + $0x28] sm:$0xff]  ;;  %v37_v18 = vld [vmem:[%s354_s0 + $0xb8] sm:$0xff]  ;;  %v20_v21 = vld [vmem:[%s354_s0 + $0x30] sm:$0xff] }
   0x6   :  { %172 = vmatprep.subr.bf16.mxu0 %v171_v8  ;;  %v177_v19 = vpack.c.bf16 %v19_v16, %v18_v15  ;;  %v179_v20 = vpack.c.bf16 %v37_v18, %v36_v17  ;;  %v21_v22 = vld [vmem:[%s354_s0 + $0x38] sm:$0xff]  ;;  %v38_v23 = vld [vmem:[%s354_s0 + $0xc0] sm:$0xff]  ;;  %v39_v24 = vld [vmem:[%s354_s0 + $0xc8] sm:$0xff] }
   0x7   :  { %v13_v25 = vld [vmem:[%s355_s1 + $0x8] sm:$0xff] }
   0x8   :  { %110 = vmatprep.mubr.f32.mxu0 %v13_v25 }
   0x9   :  { %174 = vmatpush3.bf16.msra.mxu0 %v173_v13 }
   0xa   :  { %176 = vmatprep.subr.bf16.mxu0 %v175_v14 }
   0xb   :  { %7 = vsyncpa [#allocation3], 0  ;;  %v181_v26 = vpack.c.bf16 %v21_v22, %v20_v21  ;;  %v183_v27 = vpack.c.bf16 %v39_v24, %v38_v23  ;;  %v22_v28 = vld [vmem:[%s354_s0 + $0x40] sm:$0xff]  ;;  %v23_v29 = vld [vmem:[%s354_s0 + $0x48] sm:$0xff]  ;;  %s224_s21 = smov [#allocation2]   ;;  %vm116_vm0 = vcmask 523264  }
   0xc   :  { %v40_v30 = vld [vmem:[%s354_s0 + $0xd0] sm:$0xff]  ;;  %v41_v31 = vld [vmem:[%s354_s0 + $0xd8] sm:$0xff]  ;;  %v185_v32 = vpack.c.bf16 %v23_v29, %v22_v28  ;;  %v42_v36 = vld [vmem:[%s354_s0 + $0xe0] sm:$0xff]  ;;  %s124_s22 = sshll.u32 %s224_s21, 4  ;;  %s125_s22 = int_to_ptr.vmem [resolvable:$true] %s124_s22 }
   0xd   :  { %178 = vmatpush3.bf16.msra.mxu0 %v177_v19  ;;  %v187_v33 = vpack.c.bf16 %v41_v31, %v40_v30  ;;  %v24_v34 = vld [vmem:[%s354_s0 + $0x50] sm:$0xff]  ;;  %v25_v35 = vld [vmem:[%s354_s0 + $0x58] sm:$0xff]  ;;  %v43_v37 = vld [vmem:[%s354_s0 + $0xe8] sm:$0xff]  ;;  %s200_s23 = scalar_lea.vmem %s125_s22, 128  ;;  %p205_p1 = scmp.lt.s32.totalorder %s125_s22, %s125_s22 }
   0xe   :  { %180 = vmatprep.subr.bf16.mxu0 %v179_v20  ;;  %v189_v38 = vpack.c.bf16 %v25_v35, %v24_v34  ;;  %v191_v39 = vpack.c.bf16 %v43_v37, %v42_v36  ;;  %v26_v40 = vld [vmem:[%s354_s0 + $0x60] sm:$0xff]  ;;  %v27_v41 = vld [vmem:[%s354_s0 + $0x68] sm:$0xff]  ;;  %v44_v42 = vld [vmem:[%s354_s0 + $0xf0] sm:$0xff]  ;;  %p201_p0 = scmp.ne.s32.totalorder %s125_s22, %s200_s23  ;;  %p206_p2 = scmp.lt.s32.totalorder %s200_s23, %s200_s23 }
   0xf   :  { %v45_v43 = vld [vmem:[%s354_s0 + $0xf8] sm:$0xff]  ;;  %v193_v44 = vpack.c.bf16 %v27_v41, %v26_v40  ;;  %v28_v46 = vld [vmem:[%s354_s0 + $0x70] sm:$0xff]  ;;  %v12_v49 = vld [vmem:[%s355_s1] sm:$0xff] }
  0x10   :  { %v195_v45 = vpack.c.bf16 %v45_v43, %v44_v42  ;;  %v29_v47 = vld [vmem:[%s354_s0 + $0x78] sm:$0xff]  ;;  %p207_p3 = por %p206_p2, %p205_p1 }
  0x11   :  { %182 = vmatpush3.bf16.msra.mxu0 %v181_v26  ;;  %v197_v48 = vpack.c.bf16 %v29_v47, %v28_v46 }
  0x12   :  { %184 = vmatprep.subr.bf16.mxu0 %v183_v27  ;;  %p208_p4 = pnand %p207_p3, %p201_p0 }
  0x15   :  { %186 = vmatpush3.bf16.msra.mxu0 %v185_v32 }
  0x16   :  { %188 = vmatprep.subr.bf16.mxu0 %v187_v33 }
  0x19   :  { %190 = vmatpush3.bf16.msra.mxu0 %v189_v38 }
  0x1a   :  { %192 = vmatprep.subr.bf16.mxu0 %v191_v39 }
  0x1d   :  { %194 = vmatpush3.bf16.msra.mxu0 %v193_v44 }
  0x1e   :  { %196 = vmatprep.subr.bf16.mxu0 %v195_v45 }
  0x21   :  { %198 = vmatpush3.bf16.msra.mxu0 %v197_v48 }
  0x24   :  { %111 = vmatmul.mubr.f32.vlgmr.msra.gmra.mrb[0].mxu0 %v12_v49 }
  0xf7   :  { %v164_v50 = vpop.f32.mrb[0].mxu0 }
  0xf8   :  { %v165_v51 = vpop.f32.mrb[1].mxu0 }
  0xf9   :  { %v166_v52 = vadd.f32 %v165_v51, %v164_v50 }
  0xfb   :  { %117 = vst.msk [vmem:[#allocation2] sm:$0xff] %vm116_vm0, %v166_v52 }
  0xfc   :  { %211 = shalt.err (!%p208_p4)
}
  0xfd   :  { %s212_s1 = scalar_lea.hbm %s356_s2, 128 }
  0xfe   :  { %p213_p5 = scmp.ne.s32.totalorder %s356_s2, %s212_s1  ;;  %p216_p6 = scmp.lt.u32.totalorder %s212_s1, %s356_s2 }
 0x100   :  { %p218_p7 = pnand %p216_p6, %p213_p5 }
 0x102   :  { %221 = shalt.err (!%p218_p7)
}
 0x103   :  { %127 = dma.vmem_to_hbm [thread:$0]  %s125_s22, 128, %s356_s2, [#allocation3]  }
 0x104   :  { %222 = dma.done.wait [#allocation3], 128  }
 0x105   :  { %223 = vsyncadd [#allocation3], 4294967168 }
 0x106   :  { %131 = vsyncpa [#allocation3], 1 }

</bundles_post_ra>
